<compile_context>
chip_gen: v7x
topology: tpu7x:2x2x1
jax: 0.10.0
libtpu: 0.0.40
codegen_flags: <defaults>
</compile_context>

<pallas_src>
import functools

import jax
import jax.numpy as jnp
from jax.experimental import pallas as pl
from jax.experimental.pallas import tpu as pltpu


# ---------------------------------------------------------------------------
# Kernel
# ---------------------------------------------------------------------------
def _actor_kernel(x_ref, w1_ref, b1_ref, w2_ref, b2_ref, w3_ref, b3_ref, o_ref,
                  *, use_tanh: bool):
    x = x_ref[...]                                            # f32 [tb, d_in]

    # Layer 1: bf16 MXU matmul (Mosaic pads K internally), f32 accumulate;
    # bias + ReLU in f32 on the VPU (safe on v5e which has no bf16 VPU path).
    h = jnp.dot(x.astype(jnp.bfloat16), w1_ref[...],
                preferred_element_type=jnp.float32)
    h = jnp.maximum(h + b1_ref[...], 0.0)
    # dropout == identity in eval mode.

    # Layer 2
    h = jnp.dot(h.astype(jnp.bfloat16), w2_ref[...],
                preferred_element_type=jnp.float32)
    h = jnp.maximum(h + b2_ref[...], 0.0)
    # dropout == identity in eval mode.

    # Layer 3 (tiny; kept f32 for closer PyTorch-f32 parity) + optional tanh (EUP).
    a = jnp.dot(h, w3_ref[...], preferred_element_type=jnp.float32) + b3_ref[...]
    if use_tanh:
        a = jnp.tanh(a)
    o_ref[...] = a.astype(o_ref.dtype)


# ---------------------------------------------------------------------------
# Helpers
# ---------------------------------------------------------------------------
def _round_up(x: int, m: int) -> int:
    return (x + m - 1) // m * m


@functools.lru_cache(maxsize=1)
def _tpu_vmem_info():
    """Returns (vmem_capacity_bytes, looks_like_v7x).  Conservative on failure."""
    cap = 64 << 20          # conservative default = v7x per-TC VMEM
    looks_v7x = False
    try:
        info = pltpu.get_tpu_info()
        cap = int(getattr(info, "vmem_capacity_bytes", cap))
        ver = str(getattr(info, "chip_version", ""))
        # v7x is the only generation with <=64 MiB per-TC VMEM.
        looks_v7x = ("7" in ver) or (cap <= (80 << 20))
    except Exception:
        pass
    return cap, looks_v7x


def _vmem_bytes(tb: int, d_in: int, h_p: int, d_out: int) -> int:
    """Rough resident-VMEM estimate for the fused kernel (per TensorCore)."""
    weights = (d_in * h_p + h_p * h_p) * 2 + h_p * d_out * 4   # bf16 W1/W2, f32 W3
    biases = (2 * h_p + d_out) * 4                             # f32
    io = 2 * tb * d_in * 4 + 2 * tb * d_out * 4                # double-buffered tiles
    interm = 2 * tb * h_p * 4 + 2 * tb * h_p * 2               # f32 hiddens + bf16 casts
    return weights + biases + io + interm


def prepare_actor_params(params):
    """Pad/cast the Actor weights ONCE (reused across forward calls).

    params: dict with w1t [D_in,H], b1 [1,H], w2t [H,H], b2 [1,H],
            w3t [H,D_out], b3 [1,D_out]   (float32, PyTorch layout pre-transposed)

    Returns (prepared_arrays, dims) where dims=(d_in, H, d_out) (static ints).
    Hidden width is zero-padded to a multiple of 128 lanes; zero padding is inert
    through matmul + bias(0) + relu.  W1's K dim and W3's N dim stay unpadded.
    """
    d_in, H = params["w1t"].shape
    d_out = params["w3t"].shape[1]
    h_p = _round_up(H, 128)

    prepared = {
        "w1": jnp.pad(params["w1t"], ((0, 0), (0, h_p - H))).astype(jnp.bfloat16),
        "b1": jnp.pad(params["b1"], ((0, 0), (0, h_p - H))).astype(jnp.float32),
        "w2": jnp.pad(params["w2t"], ((0, h_p - H), (0, h_p - H))).astype(jnp.bfloat16),
        "b2": jnp.pad(params["b2"], ((0, 0), (0, h_p - H))).astype(jnp.float32),
        "w3": jnp.pad(params["w3t"], ((0, h_p - H), (0, 0))).astype(jnp.float32),
        "b3": params["b3"].astype(jnp.float32),
    }
    return prepared, (int(d_in), int(H), int(d_out))


# ---------------------------------------------------------------------------
# Forward wrapper (jitted end-to-end)
# ---------------------------------------------------------------------------
@functools.partial(jax.jit, static_argnames=("dims", "tanh", "tb"))
def actor_forward(state, prepared, *, dims, tanh: bool = False, tb: int | None = None):
    """Fused Actor MLP forward.  state: [B, d_in] f32.  Returns [B, d_out] f32."""
    d_in, H, d_out = dims
    B = state.shape[0]
    assert state.shape[1] == d_in, "state feature dim mismatch"
    h_p = prepared["w1"].shape[1]

    vmem_cap, is_v7x = _tpu_vmem_info()
    multi_tc = is_v7x                      # v7x: 2 TensorCores share the batch grid

    # ---- batch tile -------------------------------------------------------
    if tb is None:
        if B >= 1024:
            m_align = 256                  # v6e/v7x MXU M-pass (also multiple of 128)
        elif B >= 256:
            m_align = 128                  # v5e MXU M-pass
        else:
            m_align = 8
        n_split = 2 if multi_tc else 1
        tb = min(1024, max(m_align, _round_up(pl.cdiv(B, 2 * n_split), m_align)))
    else:
        m_align = 8
        tb = max(8, _round_up(tb, 8))

    # Generation-aware VMEM budget (per TensorCore; on v7x weights are replicated
    # per TC when the batch axis is core-parallel, so budget against per-TC VMEM).
    budget = int(0.7 * vmem_cap)
    while tb > m_align and _vmem_bytes(tb, d_in, h_p, d_out) > budget:
        tb = max(m_align, _round_up(tb // 2, m_align))
    # TODO(synk): if H is so large that W2 alone exceeds the budget, add a K-tiled
    # ('arbitrary') reduction grid axis for layer 2 instead of shrinking tb.

    # ---- grid / batch padding (rows only; feature dim stays unpadded) -----
    step_quant = 2 * tb if (multi_tc and B > tb) else tb   # even #steps for 2 TCs
    B_p = _round_up(B, step_quant)
    grid = (B_p // tb,)

    x = state.astype(jnp.float32)
    if B_p != B:
        x = jnp.pad(x, ((0, B_p - B), (0, 0)))

    # ---- specs -------------------------------------------------------------
    vmem = pltpu.MemorySpace.VMEM
    state_spec = pl.BlockSpec((tb, d_in), lambda i: (i, 0))
    if grid[0] >= 4:
        # Deeper input pipeline for the many-step regime (per-step compute is tiny).
        try:
            state_spec = pl.BlockSpec((tb, d_in), lambda i: (i, 0),
                                      pipeline_mode=pl.Buffered(3))
        except TypeError:
            pass  # older API without pipeline_mode: keep default double-buffering

    if multi_tc and grid[0] >= 2:
        dim_sem = (getattr(pltpu, "CORE_PARALLEL", "parallel"),)
    else:
        dim_sem = ("parallel",)

    # vmem limit: leave headroom below physical (v7x: <=56 MiB), raise on 128 MiB parts.
    headroom = (8 << 20) if is_v7x else (16 << 20)
    est = _vmem_bytes(tb, d_in, h_p, d_out)
    vmem_limit = int(min(vmem_cap - headroom,
                         max(32 << 20, int(1.5 * est) + (2 << 20))))

    # Cost estimate with the TRUE (unpadded) dims.
    flops = int(2 * B * (d_in * H + H * H + H * d_out))
    bytes_accessed = int(B * d_in * 4
                         + (d_in * H + H * H) * 2 + H * d_out * 4
                         + (2 * H + d_out) * 4
                         + B * d_out * 4)
    transcendentals = int(B * d_out) if tanh else 0

    out = pl.pallas_call(
        functools.partial(_actor_kernel, use_tanh=tanh),
        out_shape=jax.ShapeDtypeStruct((B_p, d_out), jnp.float32),
        grid_spec=pltpu.PrefetchScalarGridSpec(
            num_scalar_prefetch=0,
            grid=grid,
            in_specs=[
                state_spec,                            # state tile (pipelined)
                pl.BlockSpec(memory_space=vmem),       # W1^T  [d_in, h_p]  bf16
                pl.BlockSpec(memory_space=vmem),       # b1    [1, h_p]     f32
                pl.BlockSpec(memory_space=vmem),       # W2^T  [h_p, h_p]   bf16
                pl.BlockSpec(memory_space=vmem),       # b2    [1, h_p]     f32
                pl.BlockSpec(memory_space=vmem),       # W3^T  [h_p, d_out] f32
                pl.BlockSpec(memory_space=vmem),       # b3    [1, d_out]   f32
            ],
            out_specs=pl.BlockSpec((tb, d_out), lambda i: (i, 0)),
        ),
        compiler_params=pltpu.CompilerParams(
            dimension_semantics=dim_sem,
            vmem_limit_bytes=vmem_limit),
        cost_estimate=pl.CostEstimate(
            flops=flops, transcendentals=transcendentals,
            bytes_accessed=bytes_accessed),
    )(x, prepared["w1"], prepared["b1"], prepared["w2"], prepared["b2"],
      prepared["w3"], prepared["b3"])

    return out[:B] if B_p != B else out


# ---------------------------------------------------------------------------
# Init + reference
# ---------------------------------------------------------------------------
def init_actor_params(key, input_dim, output_dim, hidden_size, init_w=0.0002):
    """Mirror of the PyTorch module's __init__ (weights stored pre-transposed)."""
    k1, k2, k3, k4, k5, k6 = jax.random.split(key, 6)
    bound1 = 1.0 / jnp.sqrt(input_dim)
    bound2 = 1.0 / jnp.sqrt(hidden_size)
    w1t = jax.random.uniform(k1, (input_dim, hidden_size), jnp.float32, -bound1, bound1)
    b1 = jax.random.uniform(k2, (1, hidden_size), jnp.float32, -bound1, bound1)
    w2t = jax.random.uniform(k3, (hidden_size, hidden_size), jnp.float32, -bound2, bound2)
    b2 = jax.random.uniform(k4, (1, hidden_size), jnp.float32, -bound2, bound2)
    w3t = jax.random.uniform(k5, (hidden_size, output_dim), jnp.float32, -init_w, init_w)
    b3 = jax.random.uniform(k6, (1, output_dim), jnp.float32, -init_w, init_w)
    return {"w1t": w1t, "b1": b1, "w2t": w2t, "b2": b2, "w3t": w3t, "b3": b3}


def actor_ref(state, params, tanh=False):
    """Pure-JAX reference with the same bf16-L1/L2, f32-L3 matmul semantics."""
    bf, f32 = jnp.bfloat16, jnp.float32
    h = jnp.dot(state.astype(bf), params["w1t"].astype(bf),
                preferred_element_type=f32) + params["b1"]
    h = jax.nn.relu(h)
    h = jnp.dot(h.astype(bf), params["w2t"].astype(bf),
                preferred_element_type=f32) + params["b2"]
    h = jax.nn.relu(h)
    a = jnp.dot(h, params["w3t"], preferred_element_type=f32) + params["b3"]
    return jnp.tanh(a) if tanh else a


if __name__ == "__main__":
    # Small, deterministic shapes: batch=8, input_dim=16, hidden=32, output_dim=4.
    B, D_IN, H, D_OUT = 8, 16, 32, 4

    key = jax.random.PRNGKey(0)
    k_state, k_params = jax.random.split(key)

    state = jax.random.normal(k_state, (B, D_IN), jnp.float32)
    params = init_actor_params(k_params, D_IN, D_OUT, H, init_w=0.0002)
    prepared, dims = prepare_actor_params(params)

    out = jax.block_until_ready(actor_forward(state, prepared, dims=dims, tanh=False))
    out_tanh = jax.block_until_ready(actor_forward(state, prepared, dims=dims, tanh=True))

    ref = actor_ref(state, params, tanh=False)
    ref_tanh = actor_ref(state, params, tanh=True)
    assert out.shape == (B, D_OUT)
    assert out_tanh.shape == (B, D_OUT)
    assert jnp.allclose(out, ref, atol=1e-4, rtol=2e-2)
    assert jnp.allclose(out_tanh, ref_tanh, atol=1e-4, rtol=2e-2)

    print("KERNEL_OK")
</pallas_src>

<mosaic_0001>
module attributes {stable_mosaic.version = 11 : i64} {
  func.func @_actor_kernel(%arg0: i32, %arg1: memref<8x16xf32, #tpu.memory_space<vmem>>, %arg2: memref<16x128xbf16, #tpu.memory_space<vmem>>, %arg3: memref<1x128xf32, #tpu.memory_space<vmem>>, %arg4: memref<128x128xbf16, #tpu.memory_space<vmem>>, %arg5: memref<1x128xf32, #tpu.memory_space<vmem>>, %arg6: memref<128x4xf32, #tpu.memory_space<vmem>>, %arg7: memref<1x4xf32, #tpu.memory_space<vmem>>, %arg8: memref<8x4xf32, #tpu.memory_space<vmem>>) attributes {dimension_semantics = [#tpu.dimension_semantics<parallel>], iteration_bounds = array<i64: 1>, scalar_prefetch = 0 : i64, scratch_operands = 0 : i64, tpu.core_type = #tpu.core_type<tc>, window_params = [{transform_indices = @transform_0, window_bounds = array<i64: 8, 16>}, {pipeline_mode = #tpu.pipeline_mode<synchronous>, transform_indices = @transform_1, window_bounds = array<i64: 16, 128>}, {pipeline_mode = #tpu.pipeline_mode<synchronous>, transform_indices = @transform_2, window_bounds = array<i64: 1, 128>}, {pipeline_mode = #tpu.pipeline_mode<synchronous>, transform_indices = @transform_3, window_bounds = array<i64: 128, 128>}, {pipeline_mode = #tpu.pipeline_mode<synchronous>, transform_indices = @transform_4, window_bounds = array<i64: 1, 128>}, {pipeline_mode = #tpu.pipeline_mode<synchronous>, transform_indices = @transform_5, window_bounds = array<i64: 128, 4>}, {pipeline_mode = #tpu.pipeline_mode<synchronous>, transform_indices = @transform_6, window_bounds = array<i64: 1, 4>}, {transform_indices = @transform_7, window_bounds = array<i64: 8, 4>}]} {
    %c0 = arith.constant 0 : index
    %c0_0 = arith.constant 0 : index
    %0 = vector.load %arg1[%c0, %c0_0] : memref<8x16xf32, #tpu.memory_space<vmem>>, vector<8x16xf32>
    %1 = arith.truncf %0 : vector<8x16xf32> to vector<8x16xbf16>
    %c0_1 = arith.constant 0 : index
    %c0_2 = arith.constant 0 : index
    %2 = vector.load %arg2[%c0_1, %c0_2] : memref<16x128xbf16, #tpu.memory_space<vmem>>, vector<16x128xbf16>
    %cst = arith.constant dense<0.000000e+00> : vector<8x128xf32>
    %3 = tpu.matmul %1, %2, %cst {dimension_numbers = #tpu.dot_dimension_numbers<[1], [0], [0], [1], [0, 0, 1, 1], [], []>} : vector<8x16xbf16>, vector<16x128xbf16>, vector<8x128xf32> -> vector<8x128xf32>
    %c0_3 = arith.constant 0 : index
    %c0_4 = arith.constant 0 : index
    %4 = vector.load %arg3[%c0_3, %c0_4] : memref<1x128xf32, #tpu.memory_space<vmem>>, vector<1x128xf32>
    %5 = vector.broadcast %4 : vector<1x128xf32> to vector<8x128xf32>
    %6 = arith.addf %3, %5 : vector<8x128xf32>
    %cst_5 = arith.constant 0.000000e+00 : f32
    %7 = vector.broadcast %cst_5 : f32 to vector<8x128xf32>
    %8 = arith.maximumf %6, %7 : vector<8x128xf32>
    %9 = arith.truncf %8 : vector<8x128xf32> to vector<8x128xbf16>
    %c0_6 = arith.constant 0 : index
    %c0_7 = arith.constant 0 : index
    %10 = vector.load %arg4[%c0_6, %c0_7] : memref<128x128xbf16, #tpu.memory_space<vmem>>, vector<128x128xbf16>
    %cst_8 = arith.constant dense<0.000000e+00> : vector<8x128xf32>
    %11 = tpu.matmul %9, %10, %cst_8 {dimension_numbers = #tpu.dot_dimension_numbers<[1], [0], [0], [1], [0, 0, 1, 1], [], []>} : vector<8x128xbf16>, vector<128x128xbf16>, vector<8x128xf32> -> vector<8x128xf32>
    %c0_9 = arith.constant 0 : index
    %c0_10 = arith.constant 0 : index
    %12 = vector.load %arg5[%c0_9, %c0_10] : memref<1x128xf32, #tpu.memory_space<vmem>>, vector<1x128xf32>
    %13 = vector.broadcast %12 : vector<1x128xf32> to vector<8x128xf32>
    %14 = arith.addf %11, %13 : vector<8x128xf32>
    %cst_11 = arith.constant 0.000000e+00 : f32
    %15 = vector.broadcast %cst_11 : f32 to vector<8x128xf32>
    %16 = arith.maximumf %14, %15 : vector<8x128xf32>
    %c0_12 = arith.constant 0 : index
    %c0_13 = arith.constant 0 : index
    %17 = vector.load %arg6[%c0_12, %c0_13] : memref<128x4xf32, #tpu.memory_space<vmem>>, vector<128x4xf32>
    %cst_14 = arith.constant dense<0.000000e+00> : vector<8x4xf32>
    %18 = tpu.matmul %16, %17, %cst_14 {dimension_numbers = #tpu.dot_dimension_numbers<[1], [0], [0], [1], [0, 0, 1, 1], [], []>} : vector<8x128xf32>, vector<128x4xf32>, vector<8x4xf32> -> vector<8x4xf32>
    %c0_15 = arith.constant 0 : index
    %c0_16 = arith.constant 0 : index
    %19 = vector.load %arg7[%c0_15, %c0_16] : memref<1x4xf32, #tpu.memory_space<vmem>>, vector<1x4xf32>
    %20 = vector.broadcast %19 : vector<1x4xf32> to vector<8x4xf32>
    %21 = arith.addf %18, %20 : vector<8x4xf32>
    %c0_17 = arith.constant 0 : index
    %c0_18 = arith.constant 0 : index
    %22 = vector.load %arg8[%c0_17, %c0_18] : memref<8x4xf32, #tpu.memory_space<vmem>>, vector<8x4xf32>
    tpu.vector_store %arg8[%c0_17, %c0_18], %21 {strides = array<i32>} : memref<8x4xf32, #tpu.memory_space<vmem>>, vector<8x4xf32>,
    return
  }
  func.func @transform_0(%arg0: i32) -> (i32, i32) {
    %c0_i32 = arith.constant 0 : i32
    %c0_i32_0 = arith.constant 0 : i32
    return %arg0, %c0_i32 : i32, i32
  }
  func.func @transform_1(%arg0: i32) -> (i32, i32) {
    %c0_i32 = arith.constant 0 : i32
    %c0_i32_0 = arith.constant 0 : i32
    %c0_i32_1 = arith.constant 0 : i32
    return %c0_i32, %c0_i32_0 : i32, i32
  }
  func.func @transform_2(%arg0: i32) -> (i32, i32) {
    %c0_i32 = arith.constant 0 : i32
    %c0_i32_0 = arith.constant 0 : i32
    %c0_i32_1 = arith.constant 0 : i32
    return %c0_i32, %c0_i32_0 : i32, i32
  }
  func.func @transform_3(%arg0: i32) -> (i32, i32) {
    %c0_i32 = arith.constant 0 : i32
    %c0_i32_0 = arith.constant 0 : i32
    %c0_i32_1 = arith.constant 0 : i32
    return %c0_i32, %c0_i32_0 : i32, i32
  }
  func.func @transform_4(%arg0: i32) -> (i32, i32) {
    %c0_i32 = arith.constant 0 : i32
    %c0_i32_0 = arith.constant 0 : i32
    %c0_i32_1 = arith.constant 0 : i32
    return %c0_i32, %c0_i32_0 : i32, i32
  }
  func.func @transform_5(%arg0: i32) -> (i32, i32) {
    %c0_i32 = arith.constant 0 : i32
    %c0_i32_0 = arith.constant 0 : i32
    %c0_i32_1 = arith.constant 0 : i32
    return %c0_i32, %c0_i32_0 : i32, i32
  }
  func.func @transform_6(%arg0: i32) -> (i32, i32) {
    %c0_i32 = arith.constant 0 : i32
    %c0_i32_0 = arith.constant 0 : i32
    %c0_i32_1 = arith.constant 0 : i32
    return %c0_i32, %c0_i32_0 : i32, i32
  }
  func.func @transform_7(%arg0: i32) -> (i32, i32) {
    %c0_i32 = arith.constant 0 : i32
    %c0_i32_0 = arith.constant 0 : i32
    return %arg0, %c0_i32 : i32, i32
  }
}

</mosaic_0001>

<bundles_post_ra>
// kernel: actor_forward.1
= control target key start
LH: loop header
LB: loop body
LE: loop exit
PB: predicated region body
PF: predicated region fallthrough
CT: control target
= control target key end

     0   :  { %v439_v0 = vmov 0.0   ;;  %vm440_vm0 = vmmov 0   ;;  %vm44_vm1 = vcmask 130048   ;;  %v441_v12 = vmov 0.0|0.0   ;;  %s572_s1 = inlined_call_operand.vmem [shape: bf16[16,128], index: 1, kind: input, shape index: {}]   ;;  %s573_s0 = inlined_call_operand.vmem [shape: f32[8,16], index: 0, kind: input, shape index: {}]   ;;  %s574_s3 = inlined_call_operand.vmem [shape: bf16[128,128], index: 3, kind: input, shape index: {}]   ;;  %s575_s5 = inlined_call_operand.vmem [shape: f32[128,4], index: 5, kind: input, shape index: {}]   ;;  %s576_s2 = inlined_call_operand.vmem [shape: f32[1,128], index: 2, kind: input, shape index: {}]   ;;  %s577_s4 = inlined_call_operand.vmem [shape: f32[1,128], index: 4, kind: input, shape index: {}]   ;;  %s578_s6 = inlined_call_operand.vmem [shape: f32[1,4], index: 6, kind: input, shape index: {}]   ;;  %s579_s7 = inlined_call_operand.vmem [shape: f32[8,4], index: 7, kind: output, shape index: {}]  }
   0x1   :  { %342 = vmatprep.subr.bf16.mxu0 %v439_v0  ;;  %v430_v1 = vld [vmem:[%s572_s1] sm:$0xff]   ;;  %344 = vmatprep.mubr.msk.bf16.mxu0 %vm440_vm0, %v439_v0  ;;  %v432_v5 = vld [vmem:[%s574_s3 + $0x8] sm:$0xff]   ;;  %v433_v6 = vld [vmem:[%s574_s3 + $0x10] sm:$0xff]   ;;  %vm295_vm2 = vcmask 31744  }
   0x2   :  { %v27_v2 = vld [vmem:[%s573_s0] sm:$0xff]  ;;  %348 = vmatprep.subr.bf16.mxu1 %v439_v0  ;;  %364 = vmatprep.mubr.msk.bf16.mxu1 %vm440_vm0, %v439_v0  ;;  %v434_v7 = vld [vmem:[%s574_s3 + $0x18] sm:$0xff]   ;;  %v436_v9 = vld [vmem:[%s574_s3 + $0x28] sm:$0xff]  }
   0x3   :  { %343 = vmatpush3.bf16.msra.mxu0 %v430_v1  ;;  %v28_v3 = vpack.c.bf16 %v27_v2, %v27_v2  ;;  %v431_v4 = vld [vmem:[%s574_s3] sm:$0xff]   ;;  %v437_v10 = vld [vmem:[%s574_s3 + $0x30] sm:$0xff]   ;;  %v438_v11 = vld [vmem:[%s574_s3 + $0x38] sm:$0xff]  }
   0x4   :  { %349 = vmatpush3.bf16.msra.mxu1 %v431_v4  ;;  %v435_v8 = vld [vmem:[%s574_s3 + $0x20] sm:$0xff]   ;;  %403 = vmatprep.subr.bf16.mxu0 %v441_v12  ;;  %v203_v14 = vld [vmem:[%s575_s5 + $0x8] sm:$0xff]  ;;  %v204_v15 = vld [vmem:[%s575_s5 + $0x10] sm:$0xff] }
   0x5   :  { %350 = vmatprep.subr.bf16.mxu1 %v439_v0  ;;  %v202_v13 = vld [vmem:[%s575_s5] sm:$0xff]  ;;  %v205_v17 = vld [vmem:[%s575_s5 + $0x18] sm:$0xff]  ;;  %v207_v20 = vld [vmem:[%s575_s5 + $0x28] sm:$0xff] }
   0x6   :  { %345 = vmatmul.mubr.msk.bf16.vlgmr.msra.gmra.mrb[0].mxu0 %vm44_vm1, %v28_v3  ;;  %v404_v16 = vpack.c.bf16 %v203_v14, %v202_v13  ;;  %v407_v18 = vpack.c.bf16 %v205_v17, %v204_v15  ;;  %v206_v19 = vld [vmem:[%s575_s5 + $0x20] sm:$0xff]  ;;  %v208_v22 = vld [vmem:[%s575_s5 + $0x30] sm:$0xff]  ;;  %v209_v23 = vld [vmem:[%s575_s5 + $0x38] sm:$0xff] }
   0x7   :  { %400 = vmatprep.mubr.msk.f32.mxu0 %vm440_vm0, %v439_v0  ;;  %v410_v21 = vpack.c.bf16 %v207_v20, %v206_v19  ;;  %v413_v24 = vpack.c.bf16 %v209_v23, %v208_v22  ;;  %v210_v25 = vld [vmem:[%s575_s5 + $0x40] sm:$0xff]  ;;  %v211_v26 = vld [vmem:[%s575_s5 + $0x48] sm:$0xff]  ;;  %v212_v28 = vld [vmem:[%s575_s5 + $0x50] sm:$0xff] }
   0x8   :  { %351 = vmatpush3.bf16.msra.mxu1 %v432_v5  ;;  %405 = vmatpush3.bf16.msra.mxu0 %v404_v16  ;;  %v416_v27 = vpack.c.bf16 %v211_v26, %v210_v25  ;;  %v213_v29 = vld [vmem:[%s575_s5 + $0x58] sm:$0xff]  ;;  %v214_v31 = vld [vmem:[%s575_s5 + $0x60] sm:$0xff]  ;;  %v215_v32 = vld [vmem:[%s575_s5 + $0x68] sm:$0xff] }
   0x9   :  { %352 = vmatprep.subr.bf16.mxu1 %v439_v0  ;;  %406 = vmatprep.subr.bf16.mxu0 %v441_v12  ;;  %v419_v30 = vpack.c.bf16 %v213_v29, %v212_v28  ;;  %v422_v33 = vpack.c.bf16 %v215_v32, %v214_v31  ;;  %v301_v34 = vld [vmem:[%s576_s2] ss:$0 sm:$0xff]  ;;  %v216_v42 = vld [vmem:[%s575_s5 + $0x70] sm:$0xff]  ;;  %v217_v43 = vld [vmem:[%s575_s5 + $0x78] sm:$0xff] }
   0xa   :  { %v425_v44 = vpack.c.bf16 %v217_v43, %v216_v42  ;;  %v304_v45 = vld [vmem:[%s577_s4] ss:$0 sm:$0xff] }
   0xb   :  { %v313_v52 = vld [vmem:[%s578_s6] ss:$0 sm:$0xff] }
   0xc   :  { %353 = vmatpush3.bf16.msra.mxu1 %v433_v6  ;;  %408 = vmatpush3.bf16.msra.mxu0 %v407_v18 }
   0xd   :  { %354 = vmatprep.subr.bf16.mxu1 %v439_v0  ;;  %409 = vmatprep.subr.bf16.mxu0 %v441_v12 }
  0x10   :  { %355 = vmatpush3.bf16.msra.mxu1 %v434_v7  ;;  %411 = vmatpush3.bf16.msra.mxu0 %v410_v21 }
  0x11   :  { %356 = vmatprep.subr.bf16.mxu1 %v439_v0  ;;  %412 = vmatprep.subr.bf16.mxu0 %v441_v12 }
  0x14   :  { %357 = vmatpush3.bf16.msra.mxu1 %v435_v8  ;;  %414 = vmatpush3.bf16.msra.mxu0 %v413_v24 }
  0x15   :  { %358 = vmatprep.subr.bf16.mxu1 %v439_v0  ;;  %415 = vmatprep.subr.bf16.mxu0 %v441_v12 }
  0x18   :  { %359 = vmatpush3.bf16.msra.mxu1 %v436_v9  ;;  %417 = vmatpush3.bf16.msra.mxu0 %v416_v27 }
  0x19   :  { %360 = vmatprep.subr.bf16.mxu1 %v439_v0  ;;  %418 = vmatprep.subr.bf16.mxu0 %v441_v12 }
  0x1c   :  { %361 = vmatpush3.bf16.msra.mxu1 %v437_v10  ;;  %420 = vmatpush3.bf16.msra.mxu0 %v419_v30 }
  0x1d   :  { %362 = vmatprep.subr.bf16.mxu1 %v439_v0  ;;  %421 = vmatprep.subr.bf16.mxu0 %v441_v12 }
  0x20   :  { %363 = vmatpush3.bf16.msra.mxu1 %v438_v11  ;;  %423 = vmatpush3.bf16.msra.mxu0 %v422_v33 }
  0x21   :  { %424 = vmatprep.subr.bf16.mxu0 %v441_v12 }
  0x24   :  { %426 = vmatpush3.bf16.msra.mxu0 %v425_v44 }
  0xd9   :  { %v82_v35 = vpop.f32.mrb[0].mxu0 }
  0xda   :  { %v83_v36 = vadd.f32 %v301_v34, %v82_v35  ;;  %v346_v37 = vpop.f32.mrb[1].mxu0 }
  0xdb   :  { %v85_v38 = vpop.f32.mrb[2].mxu0 }
  0xdc   :  { %v88_v39 = vmax.f32 %v83_v36, 0.0  ;;  %v347_v40 = vpop.f32.mrb[3].mxu0 }
  0xde   :  { %v89_v41 = vpack.c.bf16 %v88_v39, %v88_v39 }
  0xe0   :  { %365 = vmatmul.mubr.bf16.vlgmr.msra.gmra.mrb[0].mxu1 %v89_v41 }
 0x1b3   :  { %v195_v46 = vpop.f32.mrb[0].mxu1 }
 0x1b4   :  { %v196_v47 = vadd.f32 %v304_v45, %v195_v46  ;;  %v366_v48 = vpop.f32.mrb[1].mxu1 }
 0x1b5   :  { %v198_v49 = vpop.f32.mrb[2].mxu1 }
 0x1b6   :  { %v201_v50 = vmax.f32 %v196_v47, 0.0  ;;  %v367_v51 = vpop.f32.mrb[3].mxu1 }
 0x1b8   :  { %401 = vmatmul.mubr.f32.vlgmr.msra.gmra.mrb[4].mxu0 %v201_v50 }
 0x28b   :  { %v291_v53 = vpop.f32.mrb[4].mxu0 }
 0x28c   :  { %v292_v54 = vadd.f32 %v313_v52, %v291_v53  ;;  %v402_v55 = vpop.f32.mrb[5].mxu0 }
 0x28e   :  { %296 = vst.msk [vmem:[%s579_s7] sm:$0xff] %vm295_vm2, %v292_v54 }

</bundles_post_ra>
